<compile_context>
chip_gen: v7x
topology: tpu7x:2x2x1
jax: 0.10.0
libtpu: 0.0.40
codegen_flags: <defaults>
</compile_context>

<pallas_src>
import functools

import jax
import jax.numpy as jnp
import numpy as np
from jax.experimental import pallas as pl
from jax.experimental.pallas import tpu as pltpu

BN_EPS = 1e-5  # nn.BatchNorm2d default


# ----------------------------- Pallas kernel --------------------------------
def _octconv_bn_relu_kernel(cho, clo,
                            ph_ref, plo_ref, whi_ref, wlo_ref, u_ref,
                            gbh_ref, gbl_ref, oh_ref, ol_ref):
    """Both octave branches fused: conv GEMMs + training-mode BN + ReLU.

    Layout: channels on sublanes, flattened N*H*W on lanes (lane-dense).
      lo  = W_lo^T (Clo+Cho, 72) @ P_lo^T (72, Ml)   -> rows[:Clo] = h2l+l2l,
                                                        rows[Clo:] = l2h @ low res
      yh  = W_h2h^T (Cho, 36) @ P_h^T (36, Mh) + (l2h) @ U (Ml, Mh)   [nearest x2 up]
    """
    lo = jnp.dot(wlo_ref[...], plo_ref[...], preferred_element_type=jnp.float32)
    yl_pre = lo[:clo, :]                 # (Clo, Ml)
    t_l2h = lo[clo:clo + cho, :]         # (Cho, Ml)

    yh_pre = jnp.dot(whi_ref[...], ph_ref[...], preferred_element_type=jnp.float32)
    yh_pre = yh_pre + jnp.dot(t_l2h.astype(u_ref.dtype), u_ref[...],
                              preferred_element_type=jnp.float32)

    def bn_relu(s, gb):  # per-channel batch stats over the lane (M) axis, f32 math
        mean = jnp.mean(s, axis=1, keepdims=True)
        var = jnp.mean((s - mean) ** 2, axis=1, keepdims=True)      # biased (train)
        scale = gb[:, 0:1] * jax.lax.rsqrt(var + BN_EPS)
        shift = gb[:, 1:2] - mean * scale
        return jnp.maximum(s * scale + shift, 0.0)

    oh_ref[...] = bn_relu(yh_pre, gbh_ref[...]).astype(oh_ref.dtype)
    ol_ref[...] = bn_relu(yl_pre, gbl_ref[...]).astype(ol_ref.dtype)


def _full_spec(shape):
    nd = len(shape)
    return pl.BlockSpec(shape, lambda i, _nd=nd: (0,) * _nd)


def _octconv_bn_relu(ph_t, plo_t, whi_t, wlo_t, u_mat, gb_h, gb_l, cho, clo, mh, ml):
    inputs = (ph_t, plo_t, whi_t, wlo_t, u_mat, gb_h, gb_l)
    flops = 2 * (cho * ph_t.shape[0] * mh
                 + (cho + clo) * plo_t.shape[0] * ml
                 + cho * ml * mh) + 8 * (cho * mh + clo * ml)
    bytes_accessed = sum(int(np.prod(a.shape)) * a.dtype.itemsize for a in inputs) \
        + 4 * (cho * mh + clo * ml)
    return pl.pallas_call(
        functools.partial(_octconv_bn_relu_kernel, cho, clo),
        out_shape=(jax.ShapeDtypeStruct((cho, mh), jnp.float32),
                   jax.ShapeDtypeStruct((clo, ml), jnp.float32)),
        grid=(1,),  # whole (tiny) problem in one VMEM-resident block
        in_specs=[_full_spec(a.shape) for a in inputs],
        out_specs=(_full_spec((cho, mh)), _full_spec((clo, ml))),
        compiler_params=pltpu.CompilerParams(dimension_semantics=("arbitrary",)),
        cost_estimate=pl.CostEstimate(flops=flops, transcendentals=cho + clo,
                                      bytes_accessed=bytes_accessed),
    )(*inputs)


# ------------------------------- JAX glue ------------------------------------
def _cnhw(x_nchw):                      # NCHW -> CNHW (single cheap transpose per input)
    return jnp.transpose(x_nchw, (1, 0, 2, 3))


def _avgpool2_cnhw(x):                  # nn.AvgPool2d(kernel=2, stride=2) on CNHW
    C, N, H, W = x.shape
    return x.reshape(C, N, H // 2, 2, W // 2, 2).mean(axis=(3, 5))


def _im2col_t(x_cnhw, k=3, pad=1):
    """Transposed im2col: (C,N,H,W) -> (k*k*C, N*Ho*Wo); row = (dy*k+dx)*C + c."""
    C, N, H, W = x_cnhw.shape
    xp = jnp.pad(x_cnhw, ((0, 0), (0, 0), (pad, pad), (pad, pad)))
    Ho, Wo = H + 2 * pad - k + 1, W + 2 * pad - k + 1
    cols = [xp[:, :, dy:dy + Ho, dx:dx + Wo].reshape(C, N * Ho * Wo)
            for dy in range(k) for dx in range(k)]
    return jnp.concatenate(cols, axis=0)


def _w_mat_t(w):
    """PyTorch (Cout,Cin,KH,KW) -> (Cout, KH*KW*Cin); col = (dy*KW+dx)*Cin + c."""
    Cout, Cin, KH, KW = w.shape
    return jnp.transpose(w, (0, 2, 3, 1)).reshape(Cout, KH * KW * Cin)


def _upsample_matrix(n, h2, w2, dtype):
    """0/1 matrix U (Ml, Mh): t(Ml) @ U == nearest 2x spatial upsample, flattened."""
    H, W = 2 * h2, 2 * w2
    mh = n * H * W
    j = np.arange(mh)
    nn = j // (H * W)
    rem = j % (H * W)
    hh = rem // W
    ww = rem % W
    mlo = nn * (h2 * w2) + (hh // 2) * w2 + (ww // 2)
    u = np.zeros((n * h2 * w2, mh), np.float32)
    u[mlo, j] = 1.0
    return jnp.asarray(u, dtype)


def conv_bn_act_forward(x_h, x_l, params, dot_dtype=jnp.bfloat16):
    """Conv_BN_ACT forward for tuple input (x_h, x_l), alpha=0.5, k=3, pad=1, stride=1."""
    # PartialConv2d(mask=None) returns its input unchanged -> no-op here.
    # TODO(synk): stride=2 path and the general bilinear F.upsample resize are not
    # implemented; for this config (k=3, pad=1, stride=1) the bilinear resize of
    # x_h2h / x_h2l is an exact identity (spatial sizes already match).
    N, Ch, H, W = x_h.shape
    _, Cl, H2, W2 = x_l.shape
    Cho = params["w_h2h"].shape[0]
    Clo = params["w_l2l"].shape[0]
    Mh, Ml = N * H * W, N * H2 * W2

    xh_c = _cnhw(x_h)
    xl_c = _cnhw(x_l)

    ph_t = _im2col_t(xh_c).astype(dot_dtype)                       # (9*Ch, Mh)
    plo_t = jnp.concatenate([_im2col_t(_avgpool2_cnhw(xh_c)),      # (9*Ch, Ml)
                             _im2col_t(xl_c)], axis=0).astype(dot_dtype)  # +(9*Cl, Ml)

    wt_h2h = _w_mat_t(params["w_h2h"])
    wt_h2l = _w_mat_t(params["w_h2l"])
    wt_l2h = _w_mat_t(params["w_l2h"])
    wt_l2l = _w_mat_t(params["w_l2l"])

    whi_t = wt_h2h.astype(dot_dtype)                               # (Cho, 9*Ch)
    wlo_t = jnp.concatenate([
        jnp.concatenate([wt_h2l, wt_l2l], axis=1),                                 # -> y_l
        jnp.concatenate([jnp.zeros((Cho, 9 * Ch), wt_l2h.dtype), wt_l2h], axis=1),  # -> l2h
    ], axis=0).astype(dot_dtype)                                   # (Clo+Cho, 9*(Ch+Cl))

    u_mat = _upsample_matrix(N, H2, W2, dot_dtype)                 # (Ml, Mh)

    gb_h = jnp.stack([params["gamma_h"], params["beta_h"]], axis=1).astype(jnp.float32)
    gb_l = jnp.stack([params["gamma_l"], params["beta_l"]], axis=1).astype(jnp.float32)

    yh_t, yl_t = _octconv_bn_relu(ph_t, plo_t, whi_t, wlo_t, u_mat, gb_h, gb_l,
                                  Cho, Clo, Mh, Ml)

    y_h = jnp.transpose(yh_t.reshape(Cho, N, H, W), (1, 0, 2, 3))
    y_l = jnp.transpose(yl_t.reshape(Clo, N, H2, W2), (1, 0, 2, 3))
    return y_h, y_l


# ------------------------ pure-JAX reference (for check) ---------------------
def _avgpool2_nchw(x):
    N, C, H, W = x.shape
    return x.reshape(N, C, H // 2, 2, W // 2, 2).mean(axis=(3, 5))


def _reference(x_h, x_l, p):
    conv = lambda x, w: jax.lax.conv_general_dilated(
        x, w, window_strides=(1, 1), padding=((1, 1), (1, 1)),
        dimension_numbers=("NCHW", "OIHW", "NCHW"))
    xh2h = conv(x_h, p["w_h2h"])
    xh2l = conv(_avgpool2_nchw(x_h), p["w_h2l"])
    xl2h = conv(x_l, p["w_l2h"])
    xl2h = jnp.repeat(jnp.repeat(xl2h, 2, axis=2), 2, axis=3)
    xl2l = conv(x_l, p["w_l2l"])
    yh = xl2h + xh2h
    yl = xh2l + xl2l

    def bn_relu(x, g, b):
        m = x.mean(axis=(0, 2, 3), keepdims=True)
        v = ((x - m) ** 2).mean(axis=(0, 2, 3), keepdims=True)
        out = (x - m) * jax.lax.rsqrt(v + BN_EPS) * g.reshape(1, -1, 1, 1) + b.reshape(1, -1, 1, 1)
        return jnp.maximum(out, 0.0)

    return bn_relu(yh, p["gamma_h"], p["beta_h"]), bn_relu(yl, p["gamma_l"], p["beta_l"])


# ----------------------------------- main ------------------------------------
if __name__ == "__main__":
    in_channels, out_channels = 8, 8
    alpha_in = alpha_out = 0.5
    N, H, W = 2, 16, 16
    Cl = int(alpha_in * in_channels)
    Ch = in_channels - Cl
    Clo = int(alpha_out * out_channels)
    Cho = out_channels - Clo
    H2, W2 = H // 2, W // 2

    key = jax.random.PRNGKey(0)
    ks = jax.random.split(key, 6)
    params = {
        # OctaveConv sub-convs (bias=False): shapes (Cout, Cin, 3, 3)
        "w_h2h": 0.1 * jax.random.normal(ks[0], (Cho, Ch, 3, 3), jnp.float32),
        "w_h2l": 0.1 * jax.random.normal(ks[1], (Clo, Ch, 3, 3), jnp.float32),
        "w_l2h": 0.1 * jax.random.normal(ks[2], (Cho, Cl, 3, 3), jnp.float32),
        "w_l2l": 0.1 * jax.random.normal(ks[3], (Clo, Cl, 3, 3), jnp.float32),
        # BatchNorm2d default init: weight=1, bias=0
        "gamma_h": jnp.ones((Cho,), jnp.float32),
        "beta_h": jnp.zeros((Cho,), jnp.float32),
        "gamma_l": jnp.ones((Clo,), jnp.float32),
        "beta_l": jnp.zeros((Clo,), jnp.float32),
    }
    x_h = jax.random.normal(ks[4], (N, Ch, H, W), jnp.float32)
    x_l = jax.random.normal(ks[5], (N, Cl, H2, W2), jnp.float32)

    y_h, y_l = conv_bn_act_forward(x_h, x_l, params)
    jax.block_until_ready((y_h, y_l))

    r_h, r_l = _reference(x_h, x_l, params)
    assert y_h.shape == (N, Cho, H, W) and y_l.shape == (N, Clo, H2, W2)
    assert np.allclose(np.asarray(y_h), np.asarray(r_h), atol=2e-2, rtol=2e-2)
    assert np.allclose(np.asarray(y_l), np.asarray(r_l), atol=2e-2, rtol=2e-2)
    print("KERNEL_OK")
</pallas_src>

<mosaic_0001>
module attributes {stable_mosaic.version = 11 : i64} {
  func.func @_octconv_bn_relu_kernel(%arg0: i32, %arg1: memref<36x512xbf16, #tpu.memory_space<vmem>>, %arg2: memref<72x128xbf16, #tpu.memory_space<vmem>>, %arg3: memref<4x36xbf16, #tpu.memory_space<vmem>>, %arg4: memref<8x72xbf16, #tpu.memory_space<vmem>>, %arg5: memref<128x512xbf16, #tpu.memory_space<vmem>>, %arg6: memref<4x2xf32, #tpu.memory_space<vmem>>, %arg7: memref<4x2xf32, #tpu.memory_space<vmem>>, %arg8: memref<4x512xf32, #tpu.memory_space<vmem>>, %arg9: memref<4x128xf32, #tpu.memory_space<vmem>>) attributes {dimension_semantics = [#tpu.dimension_semantics<arbitrary>], iteration_bounds = array<i64: 1>, scalar_prefetch = 0 : i64, scratch_operands = 0 : i64, tpu.core_type = #tpu.core_type<tc>, window_params = [{pipeline_mode = #tpu.pipeline_mode<synchronous>, transform_indices = @transform_0, window_bounds = array<i64: 36, 512>}, {pipeline_mode = #tpu.pipeline_mode<synchronous>, transform_indices = @transform_1, window_bounds = array<i64: 72, 128>}, {pipeline_mode = #tpu.pipeline_mode<synchronous>, transform_indices = @transform_2, window_bounds = array<i64: 4, 36>}, {pipeline_mode = #tpu.pipeline_mode<synchronous>, transform_indices = @transform_3, window_bounds = array<i64: 8, 72>}, {pipeline_mode = #tpu.pipeline_mode<synchronous>, transform_indices = @transform_4, window_bounds = array<i64: 128, 512>}, {pipeline_mode = #tpu.pipeline_mode<synchronous>, transform_indices = @transform_5, window_bounds = array<i64: 4, 2>}, {pipeline_mode = #tpu.pipeline_mode<synchronous>, transform_indices = @transform_6, window_bounds = array<i64: 4, 2>}, {pipeline_mode = #tpu.pipeline_mode<synchronous>, transform_indices = @transform_7, window_bounds = array<i64: 4, 512>}, {pipeline_mode = #tpu.pipeline_mode<synchronous>, transform_indices = @transform_8, window_bounds = array<i64: 4, 128>}]} {
    %c0 = arith.constant 0 : index
    %c0_0 = arith.constant 0 : index
    %0 = vector.load %arg4[%c0, %c0_0] : memref<8x72xbf16, #tpu.memory_space<vmem>>, vector<8x72xbf16>
    %c0_1 = arith.constant 0 : index
    %c0_2 = arith.constant 0 : index
    %1 = vector.load %arg2[%c0_1, %c0_2] : memref<72x128xbf16, #tpu.memory_space<vmem>>, vector<72x128xbf16>
    %cst = arith.constant dense<0.000000e+00> : vector<8x128xf32>
    %2 = tpu.matmul %0, %1, %cst {dimension_numbers = #tpu.dot_dimension_numbers<[1], [0], [0], [1], [0, 0, 1, 1], [], []>} : vector<8x72xbf16>, vector<72x128xbf16>, vector<8x128xf32> -> vector<8x128xf32>
    %3 = vector.extract_strided_slice %2 {offsets = [0, 0], sizes = [4, 128], strides = [1, 1]} : vector<8x128xf32> to vector<4x128xf32>
    %4 = vector.extract_strided_slice %2 {offsets = [4, 0], sizes = [4, 128], strides = [1, 1]} : vector<8x128xf32> to vector<4x128xf32>
    %c0_3 = arith.constant 0 : index
    %c0_4 = arith.constant 0 : index
    %5 = vector.load %arg3[%c0_3, %c0_4] : memref<4x36xbf16, #tpu.memory_space<vmem>>, vector<4x36xbf16>
    %c0_5 = arith.constant 0 : index
    %c0_6 = arith.constant 0 : index
    %6 = vector.load %arg1[%c0_5, %c0_6] : memref<36x512xbf16, #tpu.memory_space<vmem>>, vector<36x512xbf16>
    %cst_7 = arith.constant dense<0.000000e+00> : vector<4x512xf32>
    %7 = tpu.matmul %5, %6, %cst_7 {dimension_numbers = #tpu.dot_dimension_numbers<[1], [0], [0], [1], [0, 0, 1, 1], [], []>} : vector<4x36xbf16>, vector<36x512xbf16>, vector<4x512xf32> -> vector<4x512xf32>
    %8 = arith.truncf %4 : vector<4x128xf32> to vector<4x128xbf16>
    %c0_8 = arith.constant 0 : index
    %c0_9 = arith.constant 0 : index
    %9 = vector.load %arg5[%c0_8, %c0_9] : memref<128x512xbf16, #tpu.memory_space<vmem>>, vector<128x512xbf16>
    %cst_10 = arith.constant dense<0.000000e+00> : vector<4x512xf32>
    %10 = tpu.matmul %8, %9, %cst_10 {dimension_numbers = #tpu.dot_dimension_numbers<[1], [0], [0], [1], [0, 0, 1, 1], [], []>} : vector<4x128xbf16>, vector<128x512xbf16>, vector<4x512xf32> -> vector<4x512xf32>
    %11 = arith.addf %7, %10 : vector<4x512xf32>
    %c0_11 = arith.constant 0 : index
    %c0_12 = arith.constant 0 : index
    %12 = vector.load %arg6[%c0_11, %c0_12] : memref<4x2xf32, #tpu.memory_space<vmem>>, vector<4x2xf32>
    %cst_13 = arith.constant dense<0.000000e+00> : vector<4xf32>
    %13 = vector.multi_reduction <add>, %11, %cst_13 [1] : vector<4x512xf32> to vector<4xf32>
    %14 = vector.shape_cast %13 : vector<4xf32> to vector<4x1xf32>
    %cst_14 = arith.constant 5.120000e+02 : f32
    %15 = vector.broadcast %cst_14 : f32 to vector<4x1xf32>
    %16 = arith.divf %14, %15 : vector<4x1xf32>
    %17 = vector.broadcast %16 : vector<4x1xf32> to vector<4x512xf32>
    %18 = arith.subf %11, %17 : vector<4x512xf32>
    %19 = arith.mulf %18, %18 : vector<4x512xf32>
    %cst_15 = arith.constant dense<0.000000e+00> : vector<4xf32>
    %20 = vector.multi_reduction <add>, %19, %cst_15 [1] : vector<4x512xf32> to vector<4xf32>
    %21 = vector.shape_cast %20 : vector<4xf32> to vector<4x1xf32>
    %cst_16 = arith.constant 5.120000e+02 : f32
    %22 = vector.broadcast %cst_16 : f32 to vector<4x1xf32>
    %23 = arith.divf %21, %22 : vector<4x1xf32>
    %24 = vector.extract_strided_slice %12 {offsets = [0, 0], sizes = [4, 1], strides = [1, 1]} : vector<4x2xf32> to vector<4x1xf32>
    %cst_17 = arith.constant 9.99999974E-6 : f32
    %25 = vector.broadcast %cst_17 : f32 to vector<4x1xf32>
    %26 = arith.addf %23, %25 : vector<4x1xf32>
    %27 = math.rsqrt %26 : vector<4x1xf32>
    %28 = arith.mulf %24, %27 : vector<4x1xf32>
    %29 = vector.extract_strided_slice %12 {offsets = [0, 1], sizes = [4, 1], strides = [1, 1]} : vector<4x2xf32> to vector<4x1xf32>
    %30 = arith.mulf %16, %28 : vector<4x1xf32>
    %31 = arith.subf %29, %30 : vector<4x1xf32>
    %32 = vector.broadcast %28 : vector<4x1xf32> to vector<4x512xf32>
    %33 = arith.mulf %11, %32 : vector<4x512xf32>
    %34 = vector.broadcast %31 : vector<4x1xf32> to vector<4x512xf32>
    %35 = arith.addf %33, %34 : vector<4x512xf32>
    %cst_18 = arith.constant 0.000000e+00 : f32
    %36 = vector.broadcast %cst_18 : f32 to vector<4x512xf32>
    %37 = arith.maximumf %35, %36 : vector<4x512xf32>
    %c0_19 = arith.constant 0 : index
    %c0_20 = arith.constant 0 : index
    %38 = vector.load %arg8[%c0_19, %c0_20] : memref<4x512xf32, #tpu.memory_space<vmem>>, vector<4x512xf32>
    tpu.vector_store %arg8[%c0_19, %c0_20], %37 {strides = array<i32>} : memref<4x512xf32, #tpu.memory_space<vmem>>, vector<4x512xf32>,
    %c0_21 = arith.constant 0 : index
    %c0_22 = arith.constant 0 : index
    %39 = vector.load %arg7[%c0_21, %c0_22] : memref<4x2xf32, #tpu.memory_space<vmem>>, vector<4x2xf32>
    %cst_23 = arith.constant dense<0.000000e+00> : vector<4xf32>
    %40 = vector.multi_reduction <add>, %3, %cst_23 [1] : vector<4x128xf32> to vector<4xf32>
    %41 = vector.shape_cast %40 : vector<4xf32> to vector<4x1xf32>
    %cst_24 = arith.constant 1.280000e+02 : f32
    %42 = vector.broadcast %cst_24 : f32 to vector<4x1xf32>
    %43 = arith.divf %41, %42 : vector<4x1xf32>
    %44 = vector.broadcast %43 : vector<4x1xf32> to vector<4x128xf32>
    %45 = arith.subf %3, %44 : vector<4x128xf32>
    %46 = arith.mulf %45, %45 : vector<4x128xf32>
    %cst_25 = arith.constant dense<0.000000e+00> : vector<4xf32>
    %47 = vector.multi_reduction <add>, %46, %cst_25 [1] : vector<4x128xf32> to vector<4xf32>
    %48 = vector.shape_cast %47 : vector<4xf32> to vector<4x1xf32>
    %cst_26 = arith.constant 1.280000e+02 : f32
    %49 = vector.broadcast %cst_26 : f32 to vector<4x1xf32>
    %50 = arith.divf %48, %49 : vector<4x1xf32>
    %51 = vector.extract_strided_slice %39 {offsets = [0, 0], sizes = [4, 1], strides = [1, 1]} : vector<4x2xf32> to vector<4x1xf32>
    %cst_27 = arith.constant 9.99999974E-6 : f32
    %52 = vector.broadcast %cst_27 : f32 to vector<4x1xf32>
    %53 = arith.addf %50, %52 : vector<4x1xf32>
    %54 = math.rsqrt %53 : vector<4x1xf32>
    %55 = arith.mulf %51, %54 : vector<4x1xf32>
    %56 = vector.extract_strided_slice %39 {offsets = [0, 1], sizes = [4, 1], strides = [1, 1]} : vector<4x2xf32> to vector<4x1xf32>
    %57 = arith.mulf %43, %55 : vector<4x1xf32>
    %58 = arith.subf %56, %57 : vector<4x1xf32>
    %59 = vector.broadcast %55 : vector<4x1xf32> to vector<4x128xf32>
    %60 = arith.mulf %3, %59 : vector<4x128xf32>
    %61 = vector.broadcast %58 : vector<4x1xf32> to vector<4x128xf32>
    %62 = arith.addf %60, %61 : vector<4x128xf32>
    %cst_28 = arith.constant 0.000000e+00 : f32
    %63 = vector.broadcast %cst_28 : f32 to vector<4x128xf32>
    %64 = arith.maximumf %62, %63 : vector<4x128xf32>
    %c0_29 = arith.constant 0 : index
    %c0_30 = arith.constant 0 : index
    %65 = vector.load %arg9[%c0_29, %c0_30] : memref<4x128xf32, #tpu.memory_space<vmem>>, vector<4x128xf32>
    tpu.vector_store %arg9[%c0_29, %c0_30], %64 {strides = array<i32>} : memref<4x128xf32, #tpu.memory_space<vmem>>, vector<4x128xf32>,
    return
  }
  func.func @transform_0(%arg0: i32) -> (i32, i32) {
    %c0_i32 = arith.constant 0 : i32
    %c0_i32_0 = arith.constant 0 : i32
    %c0_i32_1 = arith.constant 0 : i32
    return %c0_i32, %c0_i32_0 : i32, i32
  }
  func.func @transform_1(%arg0: i32) -> (i32, i32) {
    %c0_i32 = arith.constant 0 : i32
    %c0_i32_0 = arith.constant 0 : i32
    %c0_i32_1 = arith.constant 0 : i32
    return %c0_i32, %c0_i32_0 : i32, i32
  }
  func.func @transform_2(%arg0: i32) -> (i32, i32) {
    %c0_i32 = arith.constant 0 : i32
    %c0_i32_0 = arith.constant 0 : i32
    %c0_i32_1 = arith.constant 0 : i32
    return %c0_i32, %c0_i32_0 : i32, i32
  }
  func.func @transform_3(%arg0: i32) -> (i32, i32) {
    %c0_i32 = arith.constant 0 : i32
    %c0_i32_0 = arith.constant 0 : i32
    %c0_i32_1 = arith.constant 0 : i32
    return %c0_i32, %c0_i32_0 : i32, i32
  }
  func.func @transform_4(%arg0: i32) -> (i32, i32) {
    %c0_i32 = arith.constant 0 : i32
    %c0_i32_0 = arith.constant 0 : i32
    %c0_i32_1 = arith.constant 0 : i32
    return %c0_i32, %c0_i32_0 : i32, i32
  }
  func.func @transform_5(%arg0: i32) -> (i32, i32) {
    %c0_i32 = arith.constant 0 : i32
    %c0_i32_0 = arith.constant 0 : i32
    %c0_i32_1 = arith.constant 0 : i32
    return %c0_i32, %c0_i32_0 : i32, i32
  }
  func.func @transform_6(%arg0: i32) -> (i32, i32) {
    %c0_i32 = arith.constant 0 : i32
    %c0_i32_0 = arith.constant 0 : i32
    %c0_i32_1 = arith.constant 0 : i32
    return %c0_i32, %c0_i32_0 : i32, i32
  }
  func.func @transform_7(%arg0: i32) -> (i32, i32) {
    %c0_i32 = arith.constant 0 : i32
    %c0_i32_0 = arith.constant 0 : i32
    %c0_i32_1 = arith.constant 0 : i32
    return %c0_i32, %c0_i32_0 : i32, i32
  }
  func.func @transform_8(%arg0: i32) -> (i32, i32) {
    %c0_i32 = arith.constant 0 : i32
    %c0_i32_0 = arith.constant 0 : i32
    %c0_i32_1 = arith.constant 0 : i32
    return %c0_i32, %c0_i32_0 : i32, i32
  }
}

</mosaic_0001>

<bundles_post_ra>
// kernel: tpu_custom_call.1
= control target key start
LH: loop header
LB: loop body
LE: loop exit
PB: predicated region body
PF: predicated region fallthrough
CT: control target
= control target key end

     0   :  { %14 = vsyncpa [#allocation3], 0  ;;  %s1193_s0 = inlined_call_operand.hbm [shape: bf16[36,512], index: 0, kind: input, shape index: {}]   ;;  %s1194_s1 = inlined_call_operand.hbm [shape: bf16[72,128], index: 1, kind: input, shape index: {}]   ;;  %s1195_s2 = inlined_call_operand.vmem [shape: bf16[4,36], index: 2, kind: input, shape index: {}]   ;;  %s1196_s3 = inlined_call_operand.vmem [shape: bf16[8,72], index: 3, kind: input, shape index: {}]   ;;  %s1197_s4 = inlined_call_operand.hbm [shape: bf16[128,512], index: 4, kind: input, shape index: {}]   ;;  %s1198_s5 = inlined_call_operand.vmem [shape: f32[4,2], index: 5, kind: input, shape index: {}]   ;;  %s1199_s6 = inlined_call_operand.vmem [shape: f32[4,2], index: 6, kind: input, shape index: {}]   ;;  %s1200_s7 = inlined_call_operand.hbm [shape: f32[4,512], index: 7, kind: output, shape index: {0}]   ;;  %s1201_s8 = inlined_call_operand.hbm [shape: f32[4,128], index: 8, kind: output, shape index: {1}]  }
   0x1   :  { %15 = vsyncpa [#allocation6], 0 }
   0x2   :  { %16 = vsyncpa [#allocation4], 0 }
   0x3   :  { %17 = vsyncpa [#allocation10], 0  ;;  %s1020_s27 = smov [#allocation5]   ;;  %s902_s9 = scalar_lea.hbm %s1194_s1, 576 }
   0x4   :  { %s35_s28 = sshll.u32 %s1020_s27, 4  ;;  %p903_p0 = scmp.ne.s32.totalorder %s1194_s1, %s902_s9  ;;  %s36_s28 = int_to_ptr.vmem [resolvable:$true] %s35_s28 }
   0x5   :  { %p906_p1 = scmp.lt.u32.totalorder %s902_s9, %s1194_s1 }
   0x7   :  { %p908_p2 = pnand %p906_p1, %p903_p0 }
   0x9   :  { %911 = shalt.err (!%p908_p2)
}
   0xa   :  { %s912_s14 = scalar_lea.vmem %s36_s28, 576  ;;  %p917_p4 = scmp.lt.s32.totalorder %s36_s28, %s36_s28 }
   0xb   :  { %p913_p3 = scmp.ne.s32.totalorder %s36_s28, %s912_s14  ;;  %p918_p5 = scmp.lt.s32.totalorder %s912_s14, %s912_s14 }
   0xd   :  { %p919_p6 = por %p918_p5, %p917_p4 }
   0xf   :  { %p920_p7 = pnand %p919_p6, %p913_p3 }
  0x11   :  { %923 = shalt.err (!%p920_p7)
}
  0x12   :  { %s1021_s15 = smov 64   ;;  %s1022_s16 = smov 4  }
  0x13   :  { %41 = dma.hbm_to_vmem [thread:$0]  %s1194_s1, 576, %s36_s28, [#allocation6], %s1021_s15, %s1021_s15, %s1022_s16  }
  0x14   :  { %s1023_s19 = smov [#allocation2]   ;;  %s924_s23 = scalar_lea.hbm %s1193_s0, 1280 }
  0x15   :  { %s23_s20 = sshll.u32 %s1023_s19, 4  ;;  %p925_p8 = scmp.ne.s32.totalorder %s1193_s0, %s924_s23  ;;  %s24_s20 = int_to_ptr.vmem [resolvable:$true] %s23_s20 }
  0x16   :  { %p928_p9 = scmp.lt.u32.totalorder %s924_s23, %s1193_s0 }
  0x18   :  { %p930_p10 = pnand %p928_p9, %p925_p8 }
  0x1a   :  { %933 = shalt.err (!%p930_p10)
}
  0x1b   :  { %s934_s29 = scalar_lea.vmem %s24_s20, 1280  ;;  %p939_p12 = scmp.lt.s32.totalorder %s24_s20, %s24_s20 }
  0x1c   :  { %p935_p11 = scmp.ne.s32.totalorder %s24_s20, %s934_s29  ;;  %p940_p13 = scmp.lt.s32.totalorder %s934_s29, %s934_s29 }
  0x1e   :  { %p941_p0 = por %p940_p13, %p939_p12 }
  0x20   :  { %p942_p1 = pnand %p941_p0, %p935_p11 }
  0x22   :  { %945 = shalt.err (!%p942_p1)
}
  0x23   :  { %s1024_s1 = smov 256   ;;  %s1025_s28 = smov 16  }
  0x24   :  { %29 = dma.hbm_to_vmem [thread:$0]  %s1193_s0, 1280, %s24_s20, [#allocation3], %s1024_s1, %s1024_s1, %s1025_s28  }
  0x25   :  { %s1026_s10 = smov [#allocation7]   ;;  %s946_s14 = scalar_lea.hbm %s1197_s4, 4096 }
  0x26   :  { %s51_s11 = sshll.u32 %s1026_s10, 4  ;;  %p947_p2 = scmp.ne.s32.totalorder %s1197_s4, %s946_s14  ;;  %s52_s11 = int_to_ptr.vmem [resolvable:$true] %s51_s11 }
  0x27   :  { %p950_p3 = scmp.lt.u32.totalorder %s946_s14, %s1197_s4 }
  0x29   :  { %p952_p4 = pnand %p950_p3, %p947_p2 }
  0x2b   :  { %955 = shalt.err (!%p952_p4)
}
  0x2c   :  { %s956_s19 = scalar_lea.vmem %s52_s11, 4096  ;;  %p961_p6 = scmp.lt.s32.totalorder %s52_s11, %s52_s11 }
  0x2d   :  { %p957_p5 = scmp.ne.s32.totalorder %s52_s11, %s956_s19  ;;  %p962_p7 = scmp.lt.s32.totalorder %s956_s19, %s956_s19 }
  0x2f   :  { %p963_p8 = por %p962_p7, %p961_p6 }
  0x31   :  { %p964_p9 = pnand %p963_p8, %p957_p5 }
  0x33   :  { %967 = shalt.err (!%p964_p9)
}
  0x34   :  { %57 = dma.hbm_to_vmem [thread:$0]  %s1197_s4, 4096, %s52_s11, [#allocation6], %s1024_s1, %s1024_s1, %s1025_s28  }
  0x35   :  { %1012 = dma.done.wait [#allocation3], 1280  }
  0x36   :  { %1013 = vsyncadd [#allocation3], 4294966016 }
  0x37   :  { %1014 = dma.done.wait [#allocation6], 4672  }
  0x38   :  { %1015 = vsyncadd [#allocation6], 4294962624  ;;  %v1027_v0 = vmov 0.0   ;;  %vm1028_vm0 = vmmov 0   ;;  %v829_v1 = vld [vmem:[#allocation5] sm:$0xff]   ;;  %v830_v2 = vld [vmem:[#allocation5 + $0x8] sm:$0xff]  }
  0x39   :  { %791 = vmatprep.subr.bf16.mxu0 %v1027_v0  ;;  %801 = vmatprep.mubr.msk.bf16.mxu0 %vm1028_vm0, %v1027_v0  ;;  %v831_v3 = vld [vmem:[#allocation5 + $0x10] sm:$0xff]   ;;  %v834_v4 = vld [vmem:[#allocation7 + $0x4] ss:$16 sps:$4 sm:$0xff]   ;;  %v833_v9 = vld [vmem:[#allocation5 + $0x20] ss:$0 sps:$4 sm:$0xff]   ;;  %vm113_vm1 = vcmask 1043456  }
  0x3a   :  { %792 = vmatpush3.bf16.msra.mxu0 %v829_v1  ;;  %v836_v5 = vld [vmem:[#allocation7] ss:$16 sps:$4 sm:$0xff]   ;;  %364 = vmatprep.subr.bf16.mxu1 %v834_v4  ;;  %v840_v6 = vld [vmem:[#allocation7 + $0x24] ss:$16 sps:$4 sm:$0xff]   ;;  %v115_v13 = vsel %vm113_vm1, %v833_v9, 0  ;;  %vm109_vm2 = vcmask 588800  }
  0x3b   :  { %793 = vmatprep.subr.bf16.mxu0 %v1027_v0  ;;  %365 = vmatpush1.bf16.msra.mxu1 %v836_v5  ;;  %v842_v7 = vld [vmem:[#allocation7 + $0x20] ss:$16 sps:$4 sm:$0xff]   ;;  %v832_v8 = vld [vmem:[#allocation5 + $0x18] sm:$0xff]   ;;  %v839_v14 = vld [vmem:[#allocation7 + $0xc] ss:$16 sps:$4 sm:$0xff]   ;;  %v1029_v41 = vmov 0  }
  0x3c   :  { %366 = vmatprep.subr.bf16.mxu1 %v840_v6  ;;  %v846_v10 = vld [vmem:[#allocation7 + $0x44] ss:$16 sps:$4 sm:$0xff]   ;;  %v848_v11 = vld [vmem:[#allocation7 + $0x40] ss:$16 sps:$4 sm:$0xff]   ;;  %v72_v15 = vld [vmem:[%s1196_s3] sm:$0xf]  ;;  %396 = vmatprep.mubr.bf16.mxu1 %v1029_v41 }
  0x3d   :  { %v852_v12 = vld [vmem:[#allocation7 + $0x64] ss:$16 sps:$4 sm:$0xff]   ;;  %v854_v16 = vld [vmem:[#allocation7 + $0x60] ss:$16 sps:$4 sm:$0xff]   ;;  %v837_v18 = vld [vmem:[#allocation7 + $0x8] ss:$16 sps:$4 sm:$0xff]   ;;  %827 = vset.pattern.permute.xlu0 %v1029_v41  ;;  %825 = vset.pattern.permute.xlu1 %v1029_v41 }
  0x3e   :  { %794 = vmatpush3.bf16.msra.mxu0 %v830_v2  ;;  %v858_v17 = vld [vmem:[#allocation7 + $0x84] ss:$16 sps:$4 sm:$0xff]   ;;  %v845_v19 = vld [vmem:[#allocation7 + $0x2c] ss:$16 sps:$4 sm:$0xff]   ;;  %v843_v20 = vld [vmem:[#allocation7 + $0x28] ss:$16 sps:$4 sm:$0xff]  }
  0x3f   :  { %795 = vmatprep.subr.bf16.mxu0 %v1027_v0  ;;  %367 = vmatpush1.bf16.msra.mxu1 %v842_v7  ;;  %v860_v21 = vld [vmem:[#allocation7 + $0x80] ss:$16 sps:$4 sm:$0xff]   ;;  %v864_v22 = vld [vmem:[#allocation7 + $0xa4] ss:$16 sps:$4 sm:$0xff]   ;;  %v851_v23 = vld [vmem:[#allocation7 + $0x4c] ss:$16 sps:$4 sm:$0xff]  }
  0x40   :  { %368 = vmatprep.subr.bf16.mxu1 %v846_v10  ;;  %v866_v24 = vld [vmem:[#allocation7 + $0xa0] ss:$16 sps:$4 sm:$0xff]   ;;  %v870_v25 = vld [vmem:[#allocation7 + $0xc4] ss:$16 sps:$4 sm:$0xff]   ;;  %v849_v26 = vld [vmem:[#allocation7 + $0x48] ss:$16 sps:$4 sm:$0xff]  }
  0x41   :  { %v857_v27 = vld [vmem:[#allocation7 + $0x6c] ss:$16 sps:$4 sm:$0xff]   ;;  %v872_v28 = vld [vmem:[#allocation7 + $0xc0] ss:$16 sps:$4 sm:$0xff]   ;;  %v855_v29 = vld [vmem:[#allocation7 + $0x68] ss:$16 sps:$4 sm:$0xff]  }
  0x42   :  { %796 = vmatpush3.bf16.msra.mxu0 %v831_v3  ;;  %v863_v30 = vld [vmem:[#allocation7 + $0x8c] ss:$16 sps:$4 sm:$0xff]   ;;  %v861_v31 = vld [vmem:[#allocation7 + $0x88] ss:$16 sps:$4 sm:$0xff]   ;;  %v876_v36 = vld [vmem:[#allocation7 + $0xe4] ss:$16 sps:$4 sm:$0xff]  }
  0x43   :  { %797 = vmatprep.subr.bf16.mxu0 %v1027_v0  ;;  %369 = vmatpush1.bf16.msra.mxu1 %v848_v11  ;;  %v869_v32 = vld [vmem:[#allocation7 + $0xac] ss:$16 sps:$4 sm:$0xff]   ;;  %v867_v33 = vld [vmem:[#allocation7 + $0xa8] ss:$16 sps:$4 sm:$0xff]   ;;  %v878_v37 = vld [vmem:[#allocation7 + $0xe0] ss:$16 sps:$4 sm:$0xff]  }
  0x44   :  { %370 = vmatprep.subr.bf16.mxu1 %v852_v12  ;;  %v875_v34 = vld [vmem:[#allocation7 + $0xcc] ss:$16 sps:$4 sm:$0xff]   ;;  %v873_v35 = vld [vmem:[#allocation7 + $0xc8] ss:$16 sps:$4 sm:$0xff]   ;;  %v884_v40 = vld [vmem:[#allocation2 + $0x4] ss:$16 sps:$4 sm:$0xff]  }
  0x45   :  { %v881_v38 = vld [vmem:[#allocation7 + $0xec] ss:$16 sps:$4 sm:$0xff]   ;;  %v879_v39 = vld [vmem:[#allocation7 + $0xe8] ss:$16 sps:$4 sm:$0xff]   ;;  %v887_v49 = vld [vmem:[#allocation2 + $0x24] ss:$16 sps:$4 sm:$0xff]  }
  0x46   :  { %798 = vmatpush3.bf16.msra.mxu0 %v832_v8  ;;  %v882_v46 = vld [vmem:[#allocation2] ss:$16 sps:$4 sm:$0xff]   ;;  %vm500_vm3 = vcmask 1041408   ;;  %v892_v55 = vld [vmem:[#allocation2 + $0xc] ss:$16 sps:$4 sm:$0xff]   ;;  %vm496_vm4 = vcmask 293888  }
  0x47   :  { %799 = vmatprep.subr.bf16.mxu0 %v1027_v0  ;;  %371 = vmatpush1.bf16.msra.mxu1 %v854_v16  ;;  %v166_v50 = vld [vmem:[#allocation2 + $0x40] sm:$0x33]  ;;  %v890_v56 = vld [vmem:[#allocation2 + $0x8] ss:$16 sps:$4 sm:$0xff]   ;;  %v895_v58 = vld [vmem:[#allocation2 + $0x2c] ss:$16 sps:$4 sm:$0xff]  }
  0x48   :  { %372 = vmatprep.subr.bf16.mxu1 %v858_v17  ;;  %v885_v51 = vld [vmem:[#allocation2 + $0x20] ss:$16 sps:$4 sm:$0xff]   ;;  %v778_v52 = vcombine.high %v166_v50, %v166_v50  ;;  %v777_v53 = vcombine.low %v166_v50, %v166_v50  ;;  %v167_v59 = vld [vmem:[#allocation2 + $0x48] sm:$0x33]  ;;  %s1030_s26 = smov 1   ;;  %s1033_s27 = smov [#allocation9]  }
  0x49   :  { %v157_v57 = vld [vmem:[%s1195_s2] sm:$0x3]  ;;  %v893_v60 = vld [vmem:[#allocation2 + $0x28] ss:$16 sps:$4 sm:$0xff]   ;;  %v780_v61 = vcombine.high %v167_v59, %v167_v59  ;;  %v779_v62 = vcombine.low %v167_v59, %v167_v59  ;;  %v1031_v59 = vmov 1   ;;  %s717_s29 = sshll.u32 %s1033_s27, 4  ;;  %s718_s29 = int_to_ptr.vmem [resolvable:$true] %s717_s29 }
  0x4a   :  { %800 = vmatpush3.bf16.msra.mxu0 %v115_v13  ;;  %v502_v54 = vsel %vm500_vm3, %v777_v53, 0 }
  0x4b   :  { %405 = vmatprep.subr.bf16.mxu0 %v839_v14  ;;  %373 = vmatpush1.bf16.msra.mxu1 %v860_v21  ;;  %v508_v63 = vsel %vm500_vm3, %v779_v62, 0 }
  0x4c   :  { %374 = vmatprep.subr.bf16.mxu1 %v864_v22 }
  0x4d   :  { %802 = vmatmul.mubr.msk.bf16.vlgmr.msra.gmra.mrb[0].mxu0 %vm109_vm2, %v72_v15 }
  0x4e   :  { %406 = vmatpush1.bf16.msra.mxu0 %v837_v18  ;;  %437 = vmatprep.mubr.bf16.mxu0 %v1029_v41 }
  0x4f   :  { %407 = vmatprep.subr.bf16.mxu0 %v845_v19  ;;  %375 = vmatpush1.bf16.msra.mxu1 %v866_v24 }
  0x50   :  { %376 = vmatprep.subr.bf16.mxu1 %v870_v25 }
  0x52   :  { %408 = vmatpush1.bf16.msra.mxu0 %v843_v20 }
  0x53   :  { %409 = vmatprep.subr.bf16.mxu0 %v851_v23  ;;  %377 = vmatpush1.bf16.msra.mxu1 %v872_v28 }
  0x54   :  { %378 = vmatprep.subr.bf16.mxu1 %v876_v36 }
  0x56   :  { %410 = vmatpush1.bf16.msra.mxu0 %v849_v26 }
  0x57   :  { %411 = vmatprep.subr.bf16.mxu0 %v857_v27  ;;  %379 = vmatpush1.bf16.msra.mxu1 %v878_v37 }
  0x58   :  { %513 = vmatprep.subr.bf16.mxu1 %v884_v40 }
  0x5a   :  { %412 = vmatpush1.bf16.msra.mxu0 %v855_v29 }
  0x5b   :  { %413 = vmatprep.subr.bf16.mxu0 %v863_v30 }
  0x5e   :  { %414 = vmatpush1.bf16.msra.mxu0 %v861_v31 }
  0x5f   :  { %415 = vmatprep.subr.bf16.mxu0 %v869_v32 }
  0x62   :  { %416 = vmatpush1.bf16.msra.mxu0 %v867_v33 }
  0x63   :  { %417 = vmatprep.subr.bf16.mxu0 %v875_v34 }
  0x66   :  { %418 = vmatpush1.bf16.msra.mxu0 %v873_v35 }
  0x67   :  { %419 = vmatprep.subr.bf16.mxu0 %v881_v38 }
  0x6a   :  { %420 = vmatpush1.bf16.msra.mxu0 %v879_v39 }
 0x120   :  { %v1119_v42 = vpop.f32.mrb[0].mxu0 }
 0x121   :  { %v803_v43 = vpop.f32.mrb[1].mxu0  ;;  %v168_v44 = vpack.c.bf16 %v1119_v42, %v1119_v42  ;;  %v667_v21 = vsel %vm113_vm1, %v1119_v42, 0.0 }
 0x122   :  { %v154_v45 = vpop.f32.mrb[2].mxu0 }
 0x123   :  { %v804_v47 = vpop.f32.mrb[3].mxu0  ;;  %v202_v48 = vrot.slane %v168_v44, 2 }
 0x125   :  { %397 = vmatmul.mubr.bf16.vlgmr.msra.gmra.mrb[0].mxu1 %v202_v48  ;;  %438 = vmatmul.mubr.bf16.vlgmr.msra.gmra.mrb[4].mxu0 %v202_v48 }
 0x126   :  { %514 = vmatpush1.bf16.msra.mxu1 %v882_v46  ;;  %545 = vmatprep.mubr.bf16.mxu1 %v1029_v41 }
 0x127   :  { %515 = vmatprep.subr.bf16.mxu1 %v887_v49 }
 0x12a   :  { %516 = vmatpush1.bf16.msra.mxu1 %v885_v51  ;;  %v595_v51 = vld [vmem:[%s1198_s5] sm:$0xf]  ;;  %s1032_s5 = smov [#allocation8]  }
 0x12b   :  { %781 = vmatprep.subr.msk.bf16.mxu1 %vm500_vm3, %v778_v52 }
 0x12e   :  { %518 = vmatpush1.bf16.msra.mxu1 %v502_v54  ;;  %v666_v54 = vld [vmem:[%s1199_s6] sm:$0xf]  ;;  %s707_s6 = sshll.u32 %s1032_s5, 4  ;;  %s708_s6 = int_to_ptr.vmem [resolvable:$true] %s707_s6 }
 0x12f   :  { %554 = vmatprep.subr.bf16.mxu1 %v892_v55  ;;  %s968_s1 = scalar_lea.vmem %s708_s6, 256  ;;  %p973_p11 = scmp.lt.s32.totalorder %s708_s6, %s708_s6 }
 0x130   :  { %p969_p10 = scmp.ne.s32.totalorder %s708_s6, %s968_s1  ;;  %p974_p12 = scmp.lt.s32.totalorder %s968_s1, %s968_s1 }
 0x131   :  { %782 = vmatmul.mubr.msk.bf16.vlgmr.msra.gmra.mrb[0].mxu1 %vm496_vm4, %v157_v57 }
 0x132   :  { %555 = vmatpush1.bf16.msra.mxu1 %v890_v56  ;;  %586 = vmatprep.mubr.bf16.mxu1 %v1029_v41  ;;  %p975_p13 = por %p974_p12, %p973_p11 }
 0x133   :  { %556 = vmatprep.subr.bf16.mxu1 %v895_v58 }
 0x134   :  { %p976_p0 = pnand %p975_p13, %p969_p10 }
 0x136   :  { %557 = vmatpush1.bf16.msra.mxu1 %v893_v60 }
 0x137   :  { %783 = vmatprep.subr.msk.bf16.mxu1 %vm500_vm3, %v780_v61 }
 0x13a   :  { %559 = vmatpush1.bf16.msra.mxu1 %v508_v63 }
 0x13d   :  { %784 = vmatmul.mubr.msk.bf16.vlgmr.msra.gmra.mrb[4].mxu1 %vm496_vm4, %v157_v57 }
 0x1f8   :  { %v439_v0 = vpop.f32.mrb[4].mxu0 }
 0x1f9   :  { %v441_v1 = vpop.f32.mrb[5].mxu0 }
 0x1fa   :  { %v443_v2 = vpop.f32.mrb[6].mxu0 }
 0x1fb   :  { %v444_v3 = vpop.f32.mrb[7].mxu0 }
 0x204   :  { %v1130_v4 = vpop.f32.mrb[0].mxu1 }
 0x205   :  { %v596_v5 = vsel %vm113_vm1, %v1130_v4, 0.0  ;;  %v1134_v6 = vpop.f32.mrb[1].mxu1 }
 0x206   :  { %v597_v7 = vsel %vm113_vm1, %v1134_v6, 0.0  ;;  %v551_v8 = vpop.f32.mrb[2].mxu1 }
 0x207   :  { %v552_v9 = vpop.f32.mrb[3].mxu1  ;;  %v598_v10 = vadd.f32 %v597_v7, %v596_v5 }
 0x210   :  { %v588_v11 = vpop.f32.mrb[4].mxu1 }
 0x211   :  { %v1138_v12 = vadd.f32 %v588_v11, %v439_v0  ;;  %v590_v13 = vpop.f32.mrb[5].mxu1 }
 0x212   :  { %v1140_v14 = vadd.f32 %v590_v13, %v441_v1  ;;  %v592_v15 = vpop.f32.mrb[6].mxu1 }
 0x213   :  { %v593_v16 = vpop.f32.mrb[7].mxu1  ;;  %v599_v17 = vsel %vm113_vm1, %v1138_v12, 0.0 }
 0x214   :  { %v600_v18 = vadd.f32 %v599_v17, %v598_v10  ;;  %v601_v19 = vsel %vm113_vm1, %v1140_v14, 0.0 }
 0x216   :  { %v602_v20 = vadd.f32 %v601_v19, %v600_v18 }
 0x218   :  { %603 = vadd.xlane.f32.xlu0 %v602_v20 }
 0x21c   :  { %668 = vadd.xlane.f32.xlu0 %v667_v21 }
 0x2a5   :  { %v604_v22 = vpop.xlane.xlu0 %603 }
 0x2a6   :  { %v606_v23 = vmul.f32 0.001953125, %v604_v22 }
 0x2a8   :  { %v607_v24 = vsub.f32 %v1130_v4, %v606_v23  ;;  %v608_v25 = vsub.f32 %v1134_v6, %v606_v23  ;;  %v609_v26 = vsub.f32 %v1138_v12, %v606_v23  ;;  %v610_v27 = vsub.f32 %v1140_v14, %v606_v23 }
 0x2a9   :  { %v669_v28 = vpop.xlane.xlu0 %668 }
 0x2aa   :  { %v671_v29 = vmul.f32 0.0078125, %v669_v28  ;;  %v611_v30 = vmul.f32 %v607_v24, %v607_v24  ;;  %v612_v31 = vmul.f32 %v608_v25, %v608_v25  ;;  %v613_v32 = vmul.f32 %v609_v26, %v609_v26 }
 0x2ab   :  { %v614_v33 = vmul.f32 %v610_v27, %v610_v27 }
 0x2ac   :  { %v615_v34 = vsel %vm113_vm1, %v611_v30, 0.0  ;;  %v616_v35 = vsel %vm113_vm1, %v612_v31, 0.0  ;;  %v672_v37 = vsub.f32 %v1119_v42, %v671_v29  ;;  %v618_v38 = vsel %vm113_vm1, %v613_v32, 0.0 }
 0x2ad   :  { %v617_v36 = vadd.f32 %v616_v35, %v615_v34  ;;  %v620_v40 = vsel %vm113_vm1, %v614_v33, 0.0 }
 0x2ae   :  { %v673_v43 = vmul.f32 %v672_v37, %v672_v37 }
 0x2af   :  { %v619_v39 = vadd.f32 %v618_v38, %v617_v36 }
 0x2b0   :  { %v674_v44 = vsel %vm113_vm1, %v673_v43, 0.0 }
 0x2b1   :  { %v621_v41 = vadd.f32 %v620_v40, %v619_v39 }
 0x2b3   :  { %622 = vadd.xlane.f32.xlu1 %v621_v41 }
 0x2b7   :  { %675 = vadd.xlane.f32.xlu1 %v674_v44 }
 0x340   :  { %v623_v45 = vpop.xlane.xlu1 %622 }
 0x341   :  { %v624_v46 = vmul.f32 0.001953125, %v623_v45 }
 0x343   :  { %v625_v47 = vadd.f32 1e-05, %v624_v46 }
 0x344   :  { %v676_v48 = vpop.xlane.xlu1 %675 }
 0x345   :  { %898 = vrsqrt.f32 %v625_v47  ;;  %v677_v49 = vmul.f32 0.0078125, %v676_v48 }
 0x347   :  { %v678_v50 = vadd.f32 1e-05, %v677_v49 }
 0x349   :  { %900 = vrsqrt.f32 %v678_v50 }
 0x34f   :  { %v899_v52 = vpop.eup %898 }
 0x350   :  { %v627_v53 = vmul.f32 %v899_v52, %v595_v51 }
 0x352   :  { %v628_v55 = vmul.f32 %v627_v53, %v606_v23 }
 0x353   :  { %v901_v56 = vpop.eup %900 }
 0x354   :  { %630 = vrot.lane.b32.xlu0 %v628_v55, %s1030_s26  ;;  %v680_v57 = vmul.f32 %v901_v56, %v666_v54 }
 0x356   :  { %v681_v58 = vmul.f32 %v680_v57, %v671_v29 }
 0x358   :  { %689 = vperm.xlu0 %827, %v680_v57   ;;  %683 = vrot.lane.b32.xlu1 %v681_v58, %s1030_s26 }
 0x35c   :  { %636 = vperm.xlu1 %825, %v627_v53   ;;  %828 = vset.pattern.permute.xlu0 %v1031_v59 }
 0x360   :  { %826 = vset.pattern.permute.xlu1 %v1031_v59 }
 0x3c6   :  { %v631_v60 = vpop.permute.xlu0 %630 }
 0x3c7   :  { %v633_v61 = vsub.f32 %v595_v51, %v631_v60 }
 0x3c9   :  { %645 = vperm.xlu1 %826, %v633_v61  }
 0x3ca   :  { %v684_v62 = vpop.permute.xlu1 %683 }
 0x3cb   :  { %v686_v63 = vsub.f32 %v666_v54, %v684_v62 }
 0x3cd   :  { %695 = vperm.xlu1 %826, %v686_v63  }
 0x3d7   :  { %v690_v1 = vpop.permute.xlu0 %689 }
 0x3d8   :  { %v692_v15 = vmul.f32 %v690_v1, %v1119_v42 }
 0x3db   :  { %v637_v0 = vpop.permute.xlu1 %636 }
 0x3dc   :  { %v639_v2 = vmul.f32 %v637_v0, %v1130_v4  ;;  %v640_v3 = vmul.f32 %v637_v0, %v1134_v6  ;;  %v641_v5 = vmul.f32 %v637_v0, %v1138_v12  ;;  %v642_v7 = vmul.f32 %v637_v0, %v1140_v14 }
 0x448   :  { %v646_v8 = vpop.permute.xlu1 %645 }
 0x449   :  { %v648_v9 = vadd.f32 %v646_v8, %v639_v2  ;;  %v649_v10 = vadd.f32 %v646_v8, %v640_v3  ;;  %v650_v11 = vadd.f32 %v646_v8, %v641_v5  ;;  %v651_v13 = vadd.f32 %v646_v8, %v642_v7 }
 0x44b   :  { %v652_v16 = vmax.f32 %v648_v9, 0.0  ;;  %v653_v17 = vmax.f32 %v649_v10, 0.0  ;;  %v654_v18 = vmax.f32 %v650_v11, 0.0  ;;  %v655_v19 = vmax.f32 %v651_v13, 0.0 }
 0x44c   :  { %v696_v4 = vpop.permute.xlu1 %695 }
 0x44d   :  { %v698_v6 = vadd.f32 %v696_v4, %v692_v15  ;;  %v660_v12 = vcombine.low %v652_v16, %v653_v17  ;;  %v661_v20 = vcombine.low %v654_v18, %v655_v19 }
 0x44f   :  { %v699_v14 = vmax.f32 %v698_v6, 0.0  ;;  %664 = vst [vmem:[#allocation8] sm:$0xff] %v660_v12  ;;  %665 = vst [vmem:[#allocation8 + $0x8] sm:$0xff] %v661_v20 }
 0x450   :  { %979 = shalt.err (!%p976_p0)
}
 0x451   :  { %s980_s9 = scalar_lea.hbm %s1200_s7, 256 }
 0x452   :  { %p981_p1 = scmp.ne.s32.totalorder %s1200_s7, %s980_s9  ;;  %p984_p2 = scmp.lt.u32.totalorder %s980_s9, %s1200_s7 }
 0x454   :  { %p986_p3 = pnand %p984_p2, %p981_p1 }
 0x456   :  { %989 = shalt.err (!%p986_p3)
}
 0x457   :  { %710 = dma.vmem_to_hbm [thread:$0]  %s708_s6, 256, %s1200_s7, [#allocation4]   ;;  %700 = vst [vmem:[#allocation9] sm:$0xf] %v699_v14 }
 0x458   :  { %s990_s16 = scalar_lea.vmem %s718_s29, 64  ;;  %p995_p5 = scmp.lt.s32.totalorder %s718_s29, %s718_s29 }
 0x459   :  { %p991_p4 = scmp.ne.s32.totalorder %s718_s29, %s990_s16  ;;  %p996_p6 = scmp.lt.s32.totalorder %s990_s16, %s990_s16 }
 0x45b   :  { %p997_p7 = por %p996_p6, %p995_p5 }
 0x45d   :  { %p998_p8 = pnand %p997_p7, %p991_p4 }
 0x45f   :  { %1001 = shalt.err (!%p998_p8)
}
 0x460   :  { %s1002_s19 = scalar_lea.hbm %s1201_s8, 64 }
 0x461   :  { %p1003_p9 = scmp.ne.s32.totalorder %s1201_s8, %s1002_s19  ;;  %p1006_p10 = scmp.lt.u32.totalorder %s1002_s19, %s1201_s8 }
 0x463   :  { %p1008_p11 = pnand %p1006_p10, %p1003_p9 }
 0x465   :  { %1011 = shalt.err (!%p1008_p11)
}
 0x466   :  { %720 = dma.vmem_to_hbm [thread:$0]  %s718_s29, 64, %s1201_s8, [#allocation10]  }
 0x467   :  { %1016 = dma.done.wait [#allocation4], 256  }
 0x468   :  { %1017 = vsyncadd [#allocation4], 4294967040 }
 0x469   :  { %1018 = dma.done.wait [#allocation10], 64  }
 0x46a   :  { %1019 = vsyncadd [#allocation10], 4294967232 }
 0x46b   :  { %727 = vsyncpa [#allocation3], 1 }
 0x46c   :  { %728 = vsyncpa [#allocation6], 1 }
 0x46d   :  { %729 = vsyncpa [#allocation4], 1 }
 0x46e   :  { %730 = vsyncpa [#allocation10], 1 }

</bundles_post_ra>
